<compile_context>
chip_gen: v5e
topology: v5e:2x2
jax: 0.10.0
libtpu: 0.0.40
codegen_flags: <defaults>
</compile_context>

<pallas_src>
import jax
import jax.numpy as jnp
from jax import lax
from jax.experimental import pallas as pl
from jax.experimental.pallas import tpu as pltpu

LANE = 128


# ----------------------------------------------------------------------------- helpers
def _round_up(n, m):
    return ((n + m - 1) // m) * m


def _cdiv(a, b):
    return -(-a // b)


def _pad2(x, rows, cols):
    return jnp.pad(x, ((0, rows - x.shape[0]), (0, cols - x.shape[1])))


def _pick_tb(B, cap=2048):
    """Batch tile: single tile for small B; otherwise >=2 tiles (v7x megacore)
    derived from B so batch-padding waste stays small; capped so the f32
    intermediates stay well inside v7x's 64 MiB VMEM. Multiple of 16 (bf16)."""
    if B <= 256:
        return _round_up(max(B, 16), 16)
    ntiles = max(2, _cdiv(B, cap))
    return _round_up(_cdiv(B, ntiles), 16)


# ----------------------------------------------------------------------------- kernel
def critic_kernel(x_ref, a_ref, scale_ref, shift_ref, w1_ref, b1_ref,
                  w2_ref, b2_ref, w3_ref, b3_ref, out_ref):
    # BatchNorm affine (whole-batch stats computed in the wrapper): cheap VPU work.
    xb = (x_ref[...].astype(jnp.float32) * scale_ref[...] + shift_ref[...]
          ).astype(jnp.bfloat16)                                      # (TB, S)

    # fcs1 + ReLU (MXU, f32 accumulation).
    h1 = jnp.dot(xb, w1_ref[...], preferred_element_type=jnp.float32) + b1_ref[...]
    h1 = jnp.maximum(h1, 0.0).astype(jnp.bfloat16)                    # (TB, H1P)

    # Embed the (pre-positioned, zero-padded) actions into h1's guaranteed-zero
    # padding lanes, so fc2 is a single (TB, H1P) @ (H1P, H2P) matmul.  The
    # action rows of the combined w2 sit at the same lane positions, so this
    # exactly reproduces cat([h1, actions]) @ W2.
    split = h1.shape[-1] - a_ref.shape[-1]                            # 128-aligned
    if split:
        h1 = jnp.concatenate([h1[:, :split], h1[:, split:] + a_ref[...]], axis=1)
    else:
        h1 = h1 + a_ref[...]

    # fc2 + ReLU.
    h2 = jnp.dot(h1, w2_ref[...], preferred_element_type=jnp.float32) + b2_ref[...]
    h2 = jnp.maximum(h2, 0.0).astype(jnp.bfloat16)                    # (TB, H2P)

    # fc3 (lane-dense padded output; wrapper slices back to num_atoms).
    out_ref[...] = (jnp.dot(h2, w3_ref[...], preferred_element_type=jnp.float32)
                    + b3_ref[...])                                    # (TB, NAP)


# ----------------------------------------------------------------------------- params
def make_params(key, state_size, action_size, hidden_units=(400, 300), num_atoms=51):
    """Logical (unpadded, f32) parameters mirroring the PyTorch module.

    Linear weights are stored pre-transposed as (in_features, out_features);
    fc2's weight is split into a state-path block and an action-path block."""
    h1, h2 = hidden_units
    ks = jax.random.split(key, 6)

    def u(k, shape, lim):
        return jax.random.uniform(k, shape, jnp.float32, -lim, lim)

    # hidden_init uses fan_in = weight.size(0) == out_features (as in the module)
    lim1 = 1.0 / (h1 ** 0.5)
    lim2 = 1.0 / (h2 ** 0.5)
    lim3 = 1.0 / (num_atoms ** 0.5)

    return {
        "gamma": jnp.ones((1, state_size), jnp.float32),   # BN weight
        "beta": jnp.zeros((1, state_size), jnp.float32),   # BN bias
        "w1": u(ks[0], (state_size, h1), lim1),
        "b1": u(ks[1], (1, h1), 1.0 / (state_size ** 0.5)),
        "w2s": u(ks[2], (h1, h2), lim2),                   # fc2 rows, state path
        "w2a": u(ks[3], (action_size, h2), lim2),          # fc2 rows, action path
        "b2": u(ks[4], (1, h2), 1.0 / ((h1 + action_size) ** 0.5)),
        "w3": u(ks[5], (h2, num_atoms), lim3),
        "b3": jnp.zeros((1, num_atoms), jnp.float32),
    }


def prepare_params(params):
    """One-time prep: zero-pad feature dims to multiples of 128, pre-cast the
    matmul weights to bf16, and build the combined fc2 weight with the action
    rows parked at the LAST `A` rows of the padded h1 width."""
    S, h1 = params["w1"].shape
    A, h2 = params["w2a"].shape
    na = params["w3"].shape[1]
    assert A <= LANE  # TODO(synk): fall back to a split fc2 matmul if action_size > 128

    H1P = _round_up(h1, LANE)
    if H1P - h1 < A:            # need enough zero padding to host the action cols
        H1P += LANE
    H2P = _round_up(h2, LANE)
    NAP = _round_up(na, LANE)

    # Combined fc2 weight: state rows at [0, h1), action rows at [H1P - A, H1P).
    w2 = jnp.zeros((H1P, H2P), jnp.float32)
    w2 = w2.at[:h1, :h2].set(params["w2s"])
    w2 = w2.at[H1P - A:, :h2].set(params["w2a"])

    return {
        "gamma": params["gamma"],
        "beta": params["beta"],
        "w1": _pad2(params["w1"], S, H1P).astype(jnp.bfloat16),
        "b1": _pad2(params["b1"], 1, H1P),                              # f32
        "w2": w2.astype(jnp.bfloat16),
        "b2": _pad2(params["b2"], 1, H2P),                              # f32
        "w3": _pad2(params["w3"], H2P, NAP).astype(jnp.bfloat16),
        "b3": _pad2(params["b3"], 1, NAP),                              # f32
        "num_atoms": na,                                                # python int
        "action_size": A,                                               # python int
    }


# ----------------------------------------------------------------------------- wrapper
def critic_forward(states, actions, prepped, *, tb=None):
    B, S = states.shape
    A = actions.shape[1]
    NAP = prepped["w3"].shape[1]
    na = prepped["num_atoms"]

    # --- BatchNorm1d (training mode): whole-batch stats, biased var, eps=1e-5,
    #     computed in f32 on the UNPADDED batch; only the affine runs in-kernel.
    mean = jnp.mean(states, axis=0, keepdims=True)
    var = jnp.mean(jnp.square(states - mean), axis=0, keepdims=True)
    scale = prepped["gamma"] * lax.rsqrt(var + 1e-5)                    # (1, S) f32
    shift = prepped["beta"] - mean * scale                              # (1, S) f32

    # --- bf16 activations into the kernel (halves input DMA bytes).
    x = states.astype(jnp.bfloat16)
    # Actions parked in the last A lanes of a 128-lane block: in-kernel they
    # land on h1 columns [H1P - A, H1P), matching the combined w2's action rows.
    a = jnp.pad(actions.astype(jnp.bfloat16), ((0, 0), (LANE - A, 0)))

    # --- batch tiling.
    if tb is None:
        tb = _pick_tb(B)
    Bp = _round_up(B, tb)
    if Bp != B:
        x = jnp.pad(x, ((0, Bp - B), (0, 0)))
        a = jnp.pad(a, ((0, Bp - B), (0, 0)))
    grid = (Bp // tb,)

    def _resident(arr):
        # Full-array block with a constant block index -> stays VMEM-resident
        # across grid steps (loaded once, reused by every batch tile).
        return pl.BlockSpec(arr.shape, lambda i: (0, 0))

    out = pl.pallas_call(
        critic_kernel,
        out_shape=jax.ShapeDtypeStruct((Bp, NAP), jnp.float32),
        grid=grid,
        in_specs=[
            pl.BlockSpec((tb, S), lambda i: (i, 0)),        # states tile (bf16)
            pl.BlockSpec((tb, LANE), lambda i: (i, 0)),     # actions tile (bf16)
            _resident(scale), _resident(shift),
            _resident(prepped["w1"]), _resident(prepped["b1"]),
            _resident(prepped["w2"]), _resident(prepped["b2"]),
            _resident(prepped["w3"]), _resident(prepped["b3"]),
        ],
        out_specs=pl.BlockSpec((tb, NAP), lambda i: (i, 0)),
        compiler_params=pltpu.CompilerParams(
            dimension_semantics=("parallel",)),              # megacore on v7x
    )(x, a, scale, shift,
      prepped["w1"], prepped["b1"], prepped["w2"], prepped["b2"],
      prepped["w3"], prepped["b3"])

    return out[:B, :na]


# ----------------------------------------------------------------------------- reference
def critic_reference(states, actions, params):
    """Pure-JAX f32 reference for validation."""
    mean = jnp.mean(states, axis=0, keepdims=True)
    var = jnp.mean(jnp.square(states - mean), axis=0, keepdims=True)
    xb = (states - mean) / jnp.sqrt(var + 1e-5) * params["gamma"] + params["beta"]
    h1 = jax.nn.relu(xb @ params["w1"] + params["b1"])
    h2 = jax.nn.relu(h1 @ params["w2s"] + actions @ params["w2a"] + params["b2"])
    return h2 @ params["w3"] + params["b3"]


# TODO(synk): `distr_to_q` (softmax-weighted support sum) is a separate method,
# not part of `forward`, and is left to plain JAX if needed.
# TODO(synk): eval-mode BatchNorm (running statistics) is not implemented; the
# kernel matches the module's training-mode forward (full-batch biased stats).

if __name__ == "__main__":
    state_size, action_size, num_atoms = 33, 4, 51

    key = jax.random.PRNGKey(0)
    kp, ks1, ka1, ks2, ka2, ks3, ka3 = jax.random.split(key, 7)
    params = make_params(kp, state_size, action_size, num_atoms=num_atoms)
    prepped = prepare_params(params)

    # Small batch: single-tile path.
    B1 = 8
    states1 = jax.random.normal(ks1, (B1, state_size), jnp.float32)
    actions1 = jax.random.uniform(ka1, (B1, action_size), jnp.float32, -1.0, 1.0)
    out1 = jax.block_until_ready(critic_forward(states1, actions1, prepped))
    ref1 = critic_reference(states1, actions1, params)
    assert out1.shape == (B1, num_atoms)
    assert jnp.allclose(out1, ref1, atol=5e-2, rtol=5e-2), float(jnp.max(jnp.abs(out1 - ref1)))

    # Medium batch with an explicit small tile: exercises grid + batch padding (40 -> 48).
    B2 = 40
    states2 = jax.random.normal(ks2, (B2, state_size), jnp.float32)
    actions2 = jax.random.uniform(ka2, (B2, action_size), jnp.float32, -1.0, 1.0)
    out2 = jax.block_until_ready(critic_forward(states2, actions2, prepped, tb=16))
    ref2 = critic_reference(states2, actions2, params)
    assert out2.shape == (B2, num_atoms)
    assert jnp.allclose(out2, ref2, atol=5e-2, rtol=5e-2), float(jnp.max(jnp.abs(out2 - ref2)))

    # Larger batch with the default tile picker: >=2 grid steps (megacore path).
    B3 = 600
    states3 = jax.random.normal(ks3, (B3, state_size), jnp.float32)
    actions3 = jax.random.uniform(ka3, (B3, action_size), jnp.float32, -1.0, 1.0)
    out3 = jax.block_until_ready(critic_forward(states3, actions3, prepped))
    ref3 = critic_reference(states3, actions3, params)
    assert out3.shape == (B3, num_atoms)
    assert jnp.allclose(out3, ref3, atol=5e-2, rtol=5e-2), float(jnp.max(jnp.abs(out3 - ref3)))

    print("KERNEL_OK")
</pallas_src>

<mosaic_0001>
module attributes {stable_mosaic.version = 11 : i64} {
  func.func @critic_kernel(%arg0: i32, %arg1: memref<16x33xbf16, #tpu.memory_space<vmem>>, %arg2: memref<16x128xbf16, #tpu.memory_space<vmem>>, %arg3: memref<1x33xf32, #tpu.memory_space<vmem>>, %arg4: memref<1x33xf32, #tpu.memory_space<vmem>>, %arg5: memref<33x512xbf16, #tpu.memory_space<vmem>>, %arg6: memref<1x512xf32, #tpu.memory_space<vmem>>, %arg7: memref<512x384xbf16, #tpu.memory_space<vmem>>, %arg8: memref<1x384xf32, #tpu.memory_space<vmem>>, %arg9: memref<384x128xbf16, #tpu.memory_space<vmem>>, %arg10: memref<1x128xf32, #tpu.memory_space<vmem>>, %arg11: memref<16x128xf32, #tpu.memory_space<vmem>>) attributes {dimension_semantics = [#tpu.dimension_semantics<parallel>], iteration_bounds = array<i64: 1>, scalar_prefetch = 0 : i64, scratch_operands = 0 : i64, tpu.core_type = #tpu.core_type<tc>, window_params = [{transform_indices = @transform_0, window_bounds = array<i64: 16, 33>}, {transform_indices = @transform_1, window_bounds = array<i64: 16, 128>}, {pipeline_mode = #tpu.pipeline_mode<synchronous>, transform_indices = @transform_2, window_bounds = array<i64: 1, 33>}, {pipeline_mode = #tpu.pipeline_mode<synchronous>, transform_indices = @transform_3, window_bounds = array<i64: 1, 33>}, {pipeline_mode = #tpu.pipeline_mode<synchronous>, transform_indices = @transform_4, window_bounds = array<i64: 33, 512>}, {pipeline_mode = #tpu.pipeline_mode<synchronous>, transform_indices = @transform_5, window_bounds = array<i64: 1, 512>}, {pipeline_mode = #tpu.pipeline_mode<synchronous>, transform_indices = @transform_6, window_bounds = array<i64: 512, 384>}, {pipeline_mode = #tpu.pipeline_mode<synchronous>, transform_indices = @transform_7, window_bounds = array<i64: 1, 384>}, {pipeline_mode = #tpu.pipeline_mode<synchronous>, transform_indices = @transform_8, window_bounds = array<i64: 384, 128>}, {pipeline_mode = #tpu.pipeline_mode<synchronous>, transform_indices = @transform_9, window_bounds = array<i64: 1, 128>}, {transform_indices = @transform_10, window_bounds = array<i64: 16, 128>}]} {
    %c0 = arith.constant 0 : index
    %c0_0 = arith.constant 0 : index
    %0 = vector.load %arg1[%c0, %c0_0] : memref<16x33xbf16, #tpu.memory_space<vmem>>, vector<16x33xbf16>
    %1 = arith.extf %0 : vector<16x33xbf16> to vector<16x33xf32>
    %c0_1 = arith.constant 0 : index
    %c0_2 = arith.constant 0 : index
    %2 = vector.load %arg3[%c0_1, %c0_2] : memref<1x33xf32, #tpu.memory_space<vmem>>, vector<1x33xf32>
    %3 = vector.broadcast %2 : vector<1x33xf32> to vector<16x33xf32>
    %4 = arith.mulf %1, %3 : vector<16x33xf32>
    %c0_3 = arith.constant 0 : index
    %c0_4 = arith.constant 0 : index
    %5 = vector.load %arg4[%c0_3, %c0_4] : memref<1x33xf32, #tpu.memory_space<vmem>>, vector<1x33xf32>
    %6 = vector.broadcast %5 : vector<1x33xf32> to vector<16x33xf32>
    %7 = arith.addf %4, %6 : vector<16x33xf32>
    %8 = arith.truncf %7 : vector<16x33xf32> to vector<16x33xbf16>
    %c0_5 = arith.constant 0 : index
    %c0_6 = arith.constant 0 : index
    %9 = vector.load %arg5[%c0_5, %c0_6] : memref<33x512xbf16, #tpu.memory_space<vmem>>, vector<33x512xbf16>
    %cst = arith.constant dense<0.000000e+00> : vector<16x512xf32>
    %10 = tpu.matmul %8, %9, %cst {dimension_numbers = #tpu.dot_dimension_numbers<[1], [0], [0], [1], [0, 0, 1, 1], [], []>} : vector<16x33xbf16>, vector<33x512xbf16>, vector<16x512xf32> -> vector<16x512xf32>
    %c0_7 = arith.constant 0 : index
    %c0_8 = arith.constant 0 : index
    %11 = vector.load %arg6[%c0_7, %c0_8] : memref<1x512xf32, #tpu.memory_space<vmem>>, vector<1x512xf32>
    %12 = vector.broadcast %11 : vector<1x512xf32> to vector<16x512xf32>
    %13 = arith.addf %10, %12 : vector<16x512xf32>
    %cst_9 = arith.constant 0.000000e+00 : f32
    %14 = vector.broadcast %cst_9 : f32 to vector<16x512xf32>
    %15 = arith.maximumf %13, %14 : vector<16x512xf32>
    %16 = arith.truncf %15 : vector<16x512xf32> to vector<16x512xbf16>
    %17 = vector.extract_strided_slice %16 {offsets = [0, 0], sizes = [16, 384], strides = [1, 1]} : vector<16x512xbf16> to vector<16x384xbf16>
    %18 = vector.extract_strided_slice %16 {offsets = [0, 384], sizes = [16, 128], strides = [1, 1]} : vector<16x512xbf16> to vector<16x128xbf16>
    %c0_10 = arith.constant 0 : index
    %c0_11 = arith.constant 0 : index
    %19 = vector.load %arg2[%c0_10, %c0_11] : memref<16x128xbf16, #tpu.memory_space<vmem>>, vector<16x128xbf16>
    %20 = arith.addf %18, %19 : vector<16x128xbf16>
    %21 = tpu.concatenate %17, %20 in 1 : vector<16x384xbf16>, vector<16x128xbf16> -> vector<16x512xbf16>
    %c0_12 = arith.constant 0 : index
    %c0_13 = arith.constant 0 : index
    %22 = vector.load %arg7[%c0_12, %c0_13] : memref<512x384xbf16, #tpu.memory_space<vmem>>, vector<512x384xbf16>
    %cst_14 = arith.constant dense<0.000000e+00> : vector<16x384xf32>
    %23 = tpu.matmul %21, %22, %cst_14 {dimension_numbers = #tpu.dot_dimension_numbers<[1], [0], [0], [1], [0, 0, 1, 1], [], []>} : vector<16x512xbf16>, vector<512x384xbf16>, vector<16x384xf32> -> vector<16x384xf32>
    %c0_15 = arith.constant 0 : index
    %c0_16 = arith.constant 0 : index
    %24 = vector.load %arg8[%c0_15, %c0_16] : memref<1x384xf32, #tpu.memory_space<vmem>>, vector<1x384xf32>
    %25 = vector.broadcast %24 : vector<1x384xf32> to vector<16x384xf32>
    %26 = arith.addf %23, %25 : vector<16x384xf32>
    %cst_17 = arith.constant 0.000000e+00 : f32
    %27 = vector.broadcast %cst_17 : f32 to vector<16x384xf32>
    %28 = arith.maximumf %26, %27 : vector<16x384xf32>
    %29 = arith.truncf %28 : vector<16x384xf32> to vector<16x384xbf16>
    %c0_18 = arith.constant 0 : index
    %c0_19 = arith.constant 0 : index
    %30 = vector.load %arg9[%c0_18, %c0_19] : memref<384x128xbf16, #tpu.memory_space<vmem>>, vector<384x128xbf16>
    %cst_20 = arith.constant dense<0.000000e+00> : vector<16x128xf32>
    %31 = tpu.matmul %29, %30, %cst_20 {dimension_numbers = #tpu.dot_dimension_numbers<[1], [0], [0], [1], [0, 0, 1, 1], [], []>} : vector<16x384xbf16>, vector<384x128xbf16>, vector<16x128xf32> -> vector<16x128xf32>
    %c0_21 = arith.constant 0 : index
    %c0_22 = arith.constant 0 : index
    %32 = vector.load %arg10[%c0_21, %c0_22] : memref<1x128xf32, #tpu.memory_space<vmem>>, vector<1x128xf32>
    %33 = vector.broadcast %32 : vector<1x128xf32> to vector<16x128xf32>
    %34 = arith.addf %31, %33 : vector<16x128xf32>
    %c0_23 = arith.constant 0 : index
    %c0_24 = arith.constant 0 : index
    %35 = vector.load %arg11[%c0_23, %c0_24] : memref<16x128xf32, #tpu.memory_space<vmem>>, vector<16x128xf32>
    tpu.vector_store %arg11[%c0_23, %c0_24], %34 {strides = array<i32>} : memref<16x128xf32, #tpu.memory_space<vmem>>, vector<16x128xf32>,
    return
  }
  func.func @transform_0(%arg0: i32) -> (i32, i32) {
    %c0_i32 = arith.constant 0 : i32
    %c0_i32_0 = arith.constant 0 : i32
    return %arg0, %c0_i32 : i32, i32
  }
  func.func @transform_1(%arg0: i32) -> (i32, i32) {
    %c0_i32 = arith.constant 0 : i32
    %c0_i32_0 = arith.constant 0 : i32
    return %arg0, %c0_i32 : i32, i32
  }
  func.func @transform_2(%arg0: i32) -> (i32, i32) {
    %c0_i32 = arith.constant 0 : i32
    %c0_i32_0 = arith.constant 0 : i32
    %c0_i32_1 = arith.constant 0 : i32
    return %c0_i32, %c0_i32_0 : i32, i32
  }
  func.func @transform_3(%arg0: i32) -> (i32, i32) {
    %c0_i32 = arith.constant 0 : i32
    %c0_i32_0 = arith.constant 0 : i32
    %c0_i32_1 = arith.constant 0 : i32
    return %c0_i32, %c0_i32_0 : i32, i32
  }
  func.func @transform_4(%arg0: i32) -> (i32, i32) {
    %c0_i32 = arith.constant 0 : i32
    %c0_i32_0 = arith.constant 0 : i32
    %c0_i32_1 = arith.constant 0 : i32
    return %c0_i32, %c0_i32_0 : i32, i32
  }
  func.func @transform_5(%arg0: i32) -> (i32, i32) {
    %c0_i32 = arith.constant 0 : i32
    %c0_i32_0 = arith.constant 0 : i32
    %c0_i32_1 = arith.constant 0 : i32
    return %c0_i32, %c0_i32_0 : i32, i32
  }
  func.func @transform_6(%arg0: i32) -> (i32, i32) {
    %c0_i32 = arith.constant 0 : i32
    %c0_i32_0 = arith.constant 0 : i32
    %c0_i32_1 = arith.constant 0 : i32
    return %c0_i32, %c0_i32_0 : i32, i32
  }
  func.func @transform_7(%arg0: i32) -> (i32, i32) {
    %c0_i32 = arith.constant 0 : i32
    %c0_i32_0 = arith.constant 0 : i32
    %c0_i32_1 = arith.constant 0 : i32
    return %c0_i32, %c0_i32_0 : i32, i32
  }
  func.func @transform_8(%arg0: i32) -> (i32, i32) {
    %c0_i32 = arith.constant 0 : i32
    %c0_i32_0 = arith.constant 0 : i32
    %c0_i32_1 = arith.constant 0 : i32
    return %c0_i32, %c0_i32_0 : i32, i32
  }
  func.func @transform_9(%arg0: i32) -> (i32, i32) {
    %c0_i32 = arith.constant 0 : i32
    %c0_i32_0 = arith.constant 0 : i32
    %c0_i32_1 = arith.constant 0 : i32
    return %c0_i32, %c0_i32_0 : i32, i32
  }
  func.func @transform_10(%arg0: i32) -> (i32, i32) {
    %c0_i32 = arith.constant 0 : i32
    %c0_i32_0 = arith.constant 0 : i32
    return %arg0, %c0_i32 : i32, i32
  }
}

</mosaic_0001>

<bundles_post_ra>
// kernel: tpu_custom_call.1
= control target key start
LH: loop header
LB: loop body
LE: loop exit
PB: predicated region body
PF: predicated region fallthrough
CT: control target
= control target key end

     0   :  { %15 = vsyncpa [#allocation3], 0  ;;  %s2512_s0 = inlined_call_operand.hbm [shape: bf16[16,33], index: 0, kind: input, shape index: {}]   ;;  %s2513_s1 = inlined_call_operand.hbm [shape: bf16[16,128], index: 1, kind: input, shape index: {}]   ;;  %s2514_s2 = inlined_call_operand.hbm [shape: f32[1,33], index: 2, kind: input, shape index: {}]   ;;  %s2515_s3 = inlined_call_operand.hbm [shape: f32[1,33], index: 3, kind: input, shape index: {}]   ;;  %s2516_s4 = inlined_call_operand.hbm [shape: bf16[33,512], index: 4, kind: input, shape index: {}]   ;;  %s2517_s5 = inlined_call_operand.vmem [shape: f32[1,512], index: 5, kind: input, shape index: {}]   ;;  %s2518_s6 = inlined_call_operand.hbm [shape: bf16[512,384], index: 6, kind: input, shape index: {}]   ;;  %s2519_s7 = inlined_call_operand.hbm [shape: f32[1,384], index: 7, kind: input, shape index: {}]   ;;  %s2520_s8 = inlined_call_operand.hbm [shape: bf16[384,128], index: 8, kind: input, shape index: {}]   ;;  %s2521_s9 = inlined_call_operand.vmem [shape: f32[1,128], index: 9, kind: input, shape index: {}]   ;;  %s2522_s10 = inlined_call_operand.hbm [shape: f32[16,128], index: 10, kind: output, shape index: {}]  }
   0x1   :  { %16 = vsyncpa [#allocation6], 0 }
   0x2   :  { %17 = vsyncpa [#allocation9], 0 }
   0x3   :  { %18 = vsyncpa [#allocation12], 0 }
   0x4   :  { %19 = vsyncpa [#allocation15], 0 }
   0x5   :  { %20 = vsyncpa [#allocation4], 0  ;;  %s38_s15 = sshll.u32 %s2513_s1, 4  ;;  %s2355_s16 = smov [#allocation5]   ;;  %s39_s15 = int_to_ptr.hbm [resolvable:$true] %s38_s15 }
   0x6   :  { %s40_s17 = sshll.u32 %s2355_s16, 4  ;;  %s63_s20 = sshll.u32 %s2515_s3, 4  ;;  %s41_s17 = int_to_ptr.vmem [resolvable:$true] %s40_s17  ;;  %s64_s20 = int_to_ptr.hbm [resolvable:$true] %s63_s20 }
   0x7   :  { %s2356_s21 = smov 64   ;;  %s2357_s22 = smov 4  }
   0x8   :  { %46 = dma.hbm_to_vmem [thread:$0]  %s39_s15, 128, %s41_s17, [#allocation6], %s2356_s21, %s2356_s21, %s2357_s22  }
   0x9   :  { %s2358_s23 = smov [#allocation8]   ;;  %s88_s1 = sshll.u32 %s2518_s6, 4  ;;  %s89_s1 = int_to_ptr.hbm [resolvable:$true] %s88_s1 }
   0xa   :  { %s65_s24 = sshll.u32 %s2358_s23, 4  ;;  %s2359_s27 = smov [#allocation11]   ;;  %s66_s24 = int_to_ptr.vmem [resolvable:$true] %s65_s24 }
   0xb   :  { %68 = dma.hbm_to_vmem [thread:$0]  %s64_s20, 16, %s66_s24, [#allocation9]  }
   0xc   :  { %s90_s28 = sshll.u32 %s2359_s27, 4  ;;  %s25_s30 = sshll.u32 %s2512_s0, 4  ;;  %s91_s28 = int_to_ptr.vmem [resolvable:$true] %s90_s28  ;;  %s26_s30 = int_to_ptr.hbm [resolvable:$true] %s25_s30 }
   0xd   :  { %s2360_s11 = smov 192   ;;  %s2361_s12 = smov 12  }
   0xe   :  { %96 = dma.hbm_to_vmem [thread:$0]  %s89_s1, 12288, %s91_s28, [#allocation12], %s2360_s11, %s2360_s11, %s2361_s12  }
   0xf   :  { %s2362_s13 = smov [#allocation2]   ;;  %s52_s6 = sshll.u32 %s2514_s2, 4  ;;  %s53_s6 = int_to_ptr.hbm [resolvable:$true] %s52_s6 }
  0x10   :  { %s27_s14 = sshll.u32 %s2362_s13, 4  ;;  %s73_s0 = sshll.u32 %s2516_s4, 4  ;;  %s28_s14 = int_to_ptr.vmem [resolvable:$true] %s27_s14  ;;  %s74_s0 = int_to_ptr.hbm [resolvable:$true] %s73_s0 }
  0x11   :  { %33 = dma.hbm_to_vmem [thread:$0]  %s26_s30, 128, %s28_s14, [#allocation3], %s2356_s21, %s2356_s21, %s2357_s22  }
  0x12   :  { %s2363_s19 = smov [#allocation7]   ;;  %s2364_s23 = smov [#allocation10]  }
  0x13   :  { %s54_s20 = sshll.u32 %s2363_s19, 4  ;;  %s75_s24 = sshll.u32 %s2364_s23, 4  ;;  %s55_s20 = int_to_ptr.vmem [resolvable:$true] %s54_s20  ;;  %s76_s24 = int_to_ptr.vmem [resolvable:$true] %s75_s24 }
  0x14   :  { %57 = dma.hbm_to_vmem [thread:$0]  %s53_s6, 16, %s55_s20, [#allocation6]  }
  0x15   :  { %s2365_s25 = smov 256   ;;  %s2366_s2 = smov 16  }
  0x16   :  { %81 = dma.hbm_to_vmem [thread:$0]  %s74_s0, 1280, %s76_s24, [#allocation9], %s2365_s25, %s2365_s25, %s2366_s2  }
  0x17   :  { %s102_s27 = sshll.u32 %s2519_s7, 4  ;;  %s2367_s28 = smov [#allocation13]   ;;  %s103_s27 = int_to_ptr.hbm [resolvable:$true] %s102_s27 }
  0x18   :  { %s104_s3 = sshll.u32 %s2367_s28, 4  ;;  %s112_s30 = sshll.u32 %s2520_s8, 4  ;;  %s105_s3 = int_to_ptr.vmem [resolvable:$true] %s104_s3  ;;  %s113_s30 = int_to_ptr.hbm [resolvable:$true] %s112_s30 }
  0x19   :  { %107 = dma.hbm_to_vmem [thread:$0]  %s103_s27, 48, %s105_s3, [#allocation12]  }
  0x1a   :  { %s2368_s11 = smov [#allocation14]  }
  0x1b   :  { %s114_s12 = sshll.u32 %s2368_s11, 4  ;;  %s115_s12 = int_to_ptr.vmem [resolvable:$true] %s114_s12 }
  0x1c   :  { %120 = dma.hbm_to_vmem [thread:$0]  %s113_s30, 3072, %s115_s12, [#allocation15], %s2356_s21, %s2356_s21, %s2357_s22  }
  0x1d   :  { %2343 = dma.done.wait [#allocation3], 128  }
  0x1e   :  { %2344 = vsyncadd [#allocation3], 4294967168 }
  0x1f   :  { %2345 = dma.done.wait [#allocation6], 144  }
  0x20   :  { %2346 = vsyncadd [#allocation6], 4294967152 }
  0x21   :  { %2347 = dma.done.wait [#allocation9], 1296  }
  0x22   :  { %2348 = vsyncadd [#allocation9], 4294966000 }
  0x23   :  { %2349 = dma.done.wait [#allocation12], 12336  }
  0x24   :  { %2350 = vsyncadd [#allocation12], 4294954960 }
  0x25   :  { %2351 = dma.done.wait [#allocation15], 3072  }
  0x26   :  { %2352 = vsyncadd [#allocation15], 4294964224  ;;  %vm247_vm0 = vcmask 1040384   ;;  %v181_v0 = vld [vmem:[#allocation10 + $0x40] sm:$0x11]  ;;  %v2369_v4 = vmov 0  }
  0x27   :  { %v219_v1 = vunpack.c.l.b16 %v181_v0  ;;  %v220_v2 = vunpack.c.h.b16 %v181_v0  ;;  %v182_v3 = vld [vmem:[#allocation10 + $0x48] sm:$0x11]  ;;  %v2461_v5 = vsel %vm247_vm0, 65535, %v2369_v4  ;;  %v1472_v6 = vld [vmem:[#allocation10 + $0x20] sm:$0xf]  ;;  %vm243_vm1 = vcmask 269312  }
  0x28   :  { %v221_v7 = vunpack.c.l.b16 %v182_v3  ;;  %v2099_v8 = vld [vmem:[#allocation2] sm:$0xff]   ;;  %v2124_v12 = vld [vmem:[#allocation7] ss:$0 sm:$0xff]  ;;  %v1974_v15 = vld [vmem:[#allocation10 + $0x24] sm:$0xf]  ;;  %v222_v18 = vunpack.c.h.b16 %v182_v3  ;;  %s2370_s22 = smov [#allocation16]  }
  0x29   :  { %v231_v9 = vpack.c.b16 %v219_v1, %v219_v1  ;;  %v232_v10 = vpack.c.b16 %v220_v2, %v220_v2  ;;  %v2100_v11 = vunpack.c.l.bf16 %v2099_v8  ;;  %v1976_v13 = vld [vmem:[#allocation10 + $0x2c] sm:$0xf0]  ;;  %v1474_v16 = vld [vmem:[#allocation10 + $0x30] sm:$0xf0]  ;;  %v2101_v17 = vunpack.c.h.bf16 %v2099_v8  ;;  %v1480_v21 = vld [vmem:[#allocation10 + $0x28] sm:$0xf] }
  0x2a   :  { %v233_v14 = vpack.c.b16 %v221_v7, %v221_v7  ;;  %v1977_v22 = vld [vmem:[#allocation10 + $0x34] sm:$0xf0]  ;;  %v2125_v26 = vld [vmem:[#allocation8] ss:$0 sm:$0xff]  ;;  %v1473_v27 = vor.u32 %v1976_v13, %v1472_v6  ;;  %v1456_v28 = vld [vmem:[#allocation10] sm:$0xf]  ;;  %v1477_v30 = vor.u32 %v1974_v15, %v1474_v16  ;;  %v234_v32 = vpack.c.b16 %v222_v18, %v222_v18 }
  0x2b   :  { %v251_v19 = vand.u32 %v2461_v5, %v231_v9  ;;  %v254_v20 = vand.u32 %v2461_v5, %v232_v10  ;;  %v164_v24 = vmul.f32 %v2124_v12, %v2100_v11  ;;  %v165_v25 = vmul.f32 %v2124_v12, %v2101_v17  ;;  %v1972_v29 = vld [vmem:[#allocation10 + $0xc] sm:$0xf0]  ;;  %v1576_v31 = vld [vmem:[#allocation11 + $0xa8] sm:$0xf]  ;;  %v1970_v34 = vld [vmem:[#allocation10 + $0x4] sm:$0xf] }
  0x2c   :  { %v257_v23 = vand.u32 %v2461_v5, %v233_v14  ;;  %v1481_v33 = vor.u32 %v1977_v22, %v1480_v21  ;;  %v1458_v35 = vld [vmem:[#allocation10 + $0x10] sm:$0xf0]  ;;  %v2000_v36 = vld [vmem:[#allocation11 + $0xb0] sm:$0xf0]  ;;  %v1464_v37 = vld [vmem:[#allocation10 + $0x8] sm:$0xf]  ;;  %v1457_v46 = vor.u32 %v1972_v29, %v1456_v28  ;;  %v260_v48 = vand.u32 %v2461_v5, %v234_v32 }
  0x2d   :  { %267 = vmatpush.bf16.msra.mxu3 %v251_v19  ;;  %281 = vmatpush.bf16.msra.mxu1 %v254_v20  ;;  %v1973_v38 = vld [vmem:[#allocation10 + $0x14] sm:$0xf0]  ;;  %v1577_v39 = vor.u32 %v2000_v36, %v1576_v31  ;;  %v170_v41 = vadd.f32 %v2125_v26, %v164_v24  ;;  %v171_v42 = vadd.f32 %v2125_v26, %v165_v25  ;;  %v2024_v43 = vld [vmem:[#allocation11 + $0x170] sm:$0xf0]  ;;  %v1564_v44 = vld [vmem:[#allocation11 + $0x90] sm:$0xf] }
  0x2e   :  { %295 = vmatpush.bf16.msra.mxu2 %v257_v23  ;;  %v1672_v40 = vld [vmem:[#allocation11 + $0x168] sm:$0xf]  ;;  %v1997_v45 = vld [vmem:[#allocation11 + $0x98] sm:$0xf0]  ;;  %v1461_v47 = vor.u32 %v1970_v34, %v1458_v35  ;;  %v1465_v49 = vor.u32 %v1973_v38, %v1464_v37  ;;  %v1482_v51 = vld [vmem:[#allocation10 + $0x38] sm:$0xf0] }
  0x2f   :  { %v1975_v50 = vld [vmem:[#allocation10 + $0x2c] sm:$0xf]  ;;  %1014 = vmatpush.bf16.msra.mxu0 %v1577_v39  ;;  %v1673_v52 = vor.u32 %v2024_v43, %v1672_v40  ;;  %v1565_v53 = vor.u32 %v1997_v45, %v1564_v44  ;;  %v1660_v54 = vld [vmem:[#allocation11 + $0x150] sm:$0xf]  ;;  %v1552_v56 = vld [vmem:[#allocation11 + $0x78] sm:$0xf]  ;;  %v2467_v57 = vpack.c.bf16 %v171_v42, %v170_v41 }
  0x30   :  { %v2021_v55 = vld [vmem:[#allocation11 + $0x158] sm:$0xf0]  ;;  %v1994_v58 = vld [vmem:[#allocation11 + $0x80] sm:$0xf0]  ;;  %v1768_v59 = vld [vmem:[#allocation11 + $0x228] sm:$0xf]  ;;  %v1485_v61 = vor.u32 %v1975_v50, %v1482_v51 }
  0x31   :  { %268 = vmatpush.bf16.msra.mxu3 %v1473_v27  ;;  %282 = vmatpush.bf16.msra.mxu1 %v1477_v30  ;;  %v2048_v60 = vld [vmem:[#allocation11 + $0x230] sm:$0xf0]  ;;  %v1971_v62 = vld [vmem:[#allocation10 + $0xc] sm:$0xf]  ;;  %v1466_v63 = vld [vmem:[#allocation10 + $0x18] sm:$0xf0]  ;;  %v1661_v1 = vor.u32 %v2021_v55, %v1660_v54  ;;  %v1553_v2 = vor.u32 %v1994_v58, %v1552_v56 }
  0x32   :  { %296 = vmatpush.bf16.msra.mxu2 %v1481_v33  ;;  %v1769_v0 = vor.u32 %v2048_v60, %v1768_v59  ;;  %v1648_v3 = vld [vmem:[#allocation11 + $0x138] sm:$0xf]  ;;  %v1756_v4 = vld [vmem:[#allocation11 + $0x210] sm:$0xf]  ;;  %v2045_v5 = vld [vmem:[#allocation11 + $0x218] sm:$0xf0]  ;;  %v1469_v11 = vor.u32 %v1971_v62, %v1466_v63 }
  0x33   :  { %1015 = vmatpush.bf16.msra.mxu0 %v1565_v53  ;;  %v2018_v6 = vld [vmem:[#allocation11 + $0x140] sm:$0xf0]  ;;  %v1540_v7 = vld [vmem:[#allocation11 + $0x60] sm:$0xf]  ;;  %v1991_v8 = vld [vmem:[#allocation11 + $0x68] sm:$0xf0]  ;;  %v1757_v12 = vor.u32 %v2045_v5, %v1756_v4 }
  0x34   :  { %v1864_v9 = vld [vmem:[#allocation11 + $0x2e8] sm:$0xf]  ;;  %v2072_v10 = vld [vmem:[#allocation11 + $0x2f0] sm:$0xf0]  ;;  %v1649_v13 = vor.u32 %v2018_v6, %v1648_v3  ;;  %v1541_v14 = vor.u32 %v1991_v8, %v1540_v7  ;;  %v1636_v15 = vld [vmem:[#allocation11 + $0x120] sm:$0xf] }
  0x35   :  { %269 = vmatpush.bf16.msra.mxu3 %v1457_v46  ;;  %283 = vmatpush.bf16.msra.mxu1 %v1461_v47  ;;  %v1744_v16 = vld [vmem:[#allocation11 + $0x1f8] sm:$0xf]  ;;  %v2042_v17 = vld [vmem:[#allocation11 + $0x200] sm:$0xf0]  ;;  %v2015_v18 = vld [vmem:[#allocation11 + $0x128] sm:$0xf0]  ;;  %v1865_v21 = vor.u32 %v2072_v10, %v1864_v9 }
  0x36   :  { %297 = vmatpush.bf16.msra.mxu2 %v1465_v49  ;;  %v1528_v19 = vld [vmem:[#allocation11 + $0x48] sm:$0xf]  ;;  %v1988_v20 = vld [vmem:[#allocation11 + $0x50] sm:$0xf0]  ;;  %v1852_v22 = vld [vmem:[#allocation11 + $0x2d0] sm:$0xf]  ;;  %v1745_v24 = vor.u32 %v2042_v17, %v1744_v16  ;;  %v1637_v25 = vor.u32 %v2015_v18, %v1636_v15 }
  0x37   :  { %1016 = vmatpush.bf16.msra.mxu0 %v1553_v2  ;;  %v2069_v23 = vld [vmem:[#allocation11 + $0x2d8] sm:$0xf0]  ;;  %v1529_v26 = vor.u32 %v1988_v20, %v1528_v19  ;;  %v1624_v27 = vld [vmem:[#allocation11 + $0x108] sm:$0xf]  ;;  %v1732_v28 = vld [vmem:[#allocation11 + $0x1e0] sm:$0xf] }
  0x38   :  { %1486 = vmatmul.msk.bf16.vlgmr.msra.gmra.mxu3 %vm243_vm1, %v2467_v57  ;;  %1487 = vmatmul.msk.bf16.vlgmr.msra.gmra.mxu1 %vm243_vm1, %v2467_v57  ;;  %v2039_v29 = vld [vmem:[#allocation11 + $0x1e8] sm:$0xf0]  ;;  %v2012_v30 = vld [vmem:[#allocation11 + $0x110] sm:$0xf0]  ;;  %v1516_v31 = vld [vmem:[#allocation11 + $0x30] sm:$0xf]  ;;  %v1853_v33 = vor.u32 %v2069_v23, %v1852_v22 }
  0x39   :  { %309 = vmatpush.bf16.msrb.mxu3 %v260_v48  ;;  %1028 = vmatpush.bf16.msrb.mxu1 %v1673_v52  ;;  %v1985_v32 = vld [vmem:[#allocation11 + $0x38] sm:$0xf0]  ;;  %v1612_v34 = vld [vmem:[#allocation11 + $0xf0] sm:$0xf]  ;;  %v1733_v35 = vor.u32 %v2039_v29, %v1732_v28  ;;  %v1840_v36 = vld [vmem:[#allocation11 + $0x2b8] sm:$0xf]  ;;  %v1625_v38 = vor.u32 %v2012_v30, %v1624_v27 }
  0x3a   :  { %1488 = vmatmul.msk.bf16.vlgmr.msra.gmra.mxu2 %vm243_vm1, %v2467_v57  ;;  %v2066_v37 = vld [vmem:[#allocation11 + $0x2c0] sm:$0xf0]  ;;  %v1517_v39 = vor.u32 %v1985_v32, %v1516_v31  ;;  %v1720_v40 = vld [vmem:[#allocation11 + $0x1c8] sm:$0xf]  ;;  %v2036_v41 = vld [vmem:[#allocation11 + $0x1d0] sm:$0xf0] }
  0x3b   :  { %1042 = vmatpush.bf16.msrb.mxu2 %v1769_v0  ;;  %1017 = vmatpush.bf16.msra.mxu0 %v1541_v14  ;;  %v2009_v42 = vld [vmem:[#allocation11 + $0xf8] sm:$0xf0]  ;;  %v1504_v43 = vld [vmem:[#allocation11 + $0x18] sm:$0xf]  ;;  %v1982_v44 = vld [vmem:[#allocation11 + $0x20] sm:$0xf0]  ;;  %v1841_v45 = vor.u32 %v2066_v37, %v1840_v36  ;;  %v1721_v46 = vor.u32 %v2036_v41, %v1720_v40 }
  0x3c   :  { %v1828_v47 = vld [vmem:[#allocation11 + $0x2a0] sm:$0xf]  ;;  %v2063_v48 = vld [vmem:[#allocation11 + $0x2a8] sm:$0xf0]  ;;  %v1613_v49 = vor.u32 %v2009_v42, %v1612_v34  ;;  %v1505_v50 = vor.u32 %v1982_v44, %v1504_v43  ;;  %v1600_v51 = vld [vmem:[#allocation11 + $0xd8] sm:$0xf] }
  0x3d   :  { %310 = vmatpush.bf16.msrb.mxu3 %v1485_v61  ;;  %1029 = vmatpush.bf16.msrb.mxu1 %v1661_v1  ;;  %v1708_v52 = vld [vmem:[#allocation11 + $0x1b0] sm:$0xf]  ;;  %v2033_v53 = vld [vmem:[#allocation11 + $0x1b8] sm:$0xf0]  ;;  %v2006_v54 = vld [vmem:[#allocation11 + $0xe0] sm:$0xf0]  ;;  %v1829_v60 = vor.u32 %v2063_v48, %v1828_v47 }
  0x3e   :  { %v1492_v55 = vld [vmem:[#allocation11] sm:$0xf]  ;;  %v1979_v56 = vld [vmem:[#allocation11 + $0x8] sm:$0xf0]  ;;  %v1578_v59 = vld [vmem:[#allocation11 + $0xb4] sm:$0xf0]  ;;  %v1709_v61 = vor.u32 %v2033_v53, %v1708_v52  ;;  %v1601_v62 = vor.u32 %v2006_v54, %v1600_v51 }
  0x3f   :  { %1043 = vmatpush.bf16.msrb.mxu2 %v1757_v12  ;;  %1018 = vmatpush.bf16.msra.mxu0 %v1529_v26  ;;  %v1999_v58 = vld [vmem:[#allocation11 + $0xac] sm:$0xf]  ;;  %v1493_v63 = vor.u32 %v1979_v56, %v1492_v55  ;;  %v1588_v0 = vld [vmem:[#allocation11 + $0xc0] sm:$0xf]  ;;  %v1674_v4 = vld [vmem:[#allocation11 + $0x174] sm:$0xf0] }
  0x40   :  { %v2003_v1 = vld [vmem:[#allocation11 + $0xc8] sm:$0xf0]  ;;  %v1581_v2 = vor.u32 %v1999_v58, %v1578_v59  ;;  %v1996_v5 = vld [vmem:[#allocation11 + $0x94] sm:$0xf]  ;;  %v1662_v10 = vld [vmem:[#allocation11 + $0x15c] sm:$0xf0] }
  0x41   :  { %311 = vmatpush.bf16.msrb.mxu3 %v1469_v11  ;;  %1030 = vmatpush.bf16.msrb.mxu1 %v1649_v13  ;;  %v2023_v3 = vld [vmem:[#allocation11 + $0x16c] sm:$0xf]  ;;  %v1589_v6 = vor.u32 %v2003_v1, %v1588_v0  ;;  %v2020_v9 = vld [vmem:[#allocation11 + $0x154] sm:$0xf]  ;;  %v1993_v11 = vld [vmem:[#allocation11 + $0x7c] sm:$0xf] }
  0x42   :  { %v1677_v7 = vor.u32 %v2023_v3, %v1674_v4  ;;  %v1554_v12 = vld [vmem:[#allocation11 + $0x84] sm:$0xf0]  ;;  %v1665_v13 = vor.u32 %v2020_v9, %v1662_v10  ;;  %v2017_v15 = vld [vmem:[#allocation11 + $0x13c] sm:$0xf]  ;;  %v1696_v18 = vld [vmem:[#allocation11 + $0x198] sm:$0xf] }
  0x43   :  { %1044 = vmatpush.bf16.msrb.mxu2 %v1745_v24  ;;  %1019 = vmatpush.bf16.msra.mxu0 %v1517_v39  ;;  %v1557_v14 = vor.u32 %v1993_v11, %v1554_v12  ;;  %v1650_v16 = vld [vmem:[#allocation11 + $0x144] sm:$0xf0]  ;;  %v2030_v19 = vld [vmem:[#allocation11 + $0x1a0] sm:$0xf0]  ;;  %v2060_v22 = vld [vmem:[#allocation11 + $0x290] sm:$0xf0] }
  0x44   :  { %v1653_v17 = vor.u32 %v2017_v15, %v1650_v16  ;;  %v1697_v20 = vor.u32 %v2030_v19, %v1696_v18  ;;  %v1990_v23 = vld [vmem:[#allocation11 + $0x64] sm:$0xf]  ;;  %v1638_v27 = vld [vmem:[#allocation11 + $0x12c] sm:$0xf0]  ;;  %v1684_v30 = vld [vmem:[#allocation11 + $0x180] sm:$0xf] }
  0x45   :  { %1056 = vmatpush.bf16.msra.mxu3 %v1865_v21  ;;  %1031 = vmatpush.bf16.msrb.mxu1 %v1637_v25  ;;  %v1816_v21 = vld [vmem:[#allocation11 + $0x288] sm:$0xf]  ;;  %v1542_v25 = vld [vmem:[#allocation11 + $0x6c] sm:$0xf0]  ;;  %v2014_v26 = vld [vmem:[#allocation11 + $0x124] sm:$0xf] }
  0x46   :  { %v1817_v24 = vor.u32 %v2060_v22, %v1816_v21  ;;  %v1545_v28 = vor.u32 %v1990_v23, %v1542_v25  ;;  %v1641_v29 = vor.u32 %v2014_v26, %v1638_v27  ;;  %v2027_v31 = vld [vmem:[#allocation11 + $0x188] sm:$0xf0]  ;;  %v1804_v32 = vld [vmem:[#allocation11 + $0x270] sm:$0xf]  ;;  %v2057_v34 = vld [vmem:[#allocation11 + $0x278] sm:$0xf0] }
  0x47   :  { %1045 = vmatpush.bf16.msrb.mxu2 %v1733_v35  ;;  %1020 = vmatpush.bf16.msra.mxu0 %v1505_v50  ;;  %v1987_v35 = vld [vmem:[#allocation11 + $0x4c] sm:$0xf]  ;;  %v1530_v36 = vld [vmem:[#allocation11 + $0x54] sm:$0xf0]  ;;  %v1805_v37 = vor.u32 %v2057_v34, %v1804_v32  ;;  %v1984_v48 = vld [vmem:[#allocation11 + $0x34] sm:$0xf] }
  0x48   :  { %1489 = vmatmul.msk.bf16.vlgmr.msrb.gmra.mxu3 %vm243_vm1, %v2467_v57  ;;  %v1566_v57 = vld [vmem:[#allocation11 + $0x9c] sm:$0xf0]  ;;  %v2011_v39 = vld [vmem:[#allocation11 + $0x10c] sm:$0xf]  ;;  %v1626_v40 = vld [vmem:[#allocation11 + $0x114] sm:$0xf0] }
  0x49   :  { %1057 = vmatpush.bf16.msra.mxu3 %v1853_v33  ;;  %1032 = vmatpush.bf16.msrb.mxu1 %v1625_v38  ;;  %v1569_v8 = vor.u32 %v1996_v5, %v1566_v57  ;;  %v1685_v33 = vor.u32 %v2027_v31, %v1684_v30  ;;  %v1533_v38 = vor.u32 %v1987_v35, %v1530_v36  ;;  %v2047_v41 = vld [vmem:[#allocation11 + $0x22c] sm:$0xf]  ;;  %v1770_v43 = vld [vmem:[#allocation11 + $0x234] sm:$0xf0]  ;;  %v2008_v50 = vld [vmem:[#allocation11 + $0xf4] sm:$0xf] }
  0x4a   :  { %v1629_v42 = vor.u32 %v2011_v39, %v1626_v40  ;;  %v1773_v44 = vor.u32 %v2047_v41, %v1770_v43  ;;  %v1614_v52 = vld [vmem:[#allocation11 + $0xfc] sm:$0xf0]  ;;  %v2044_v53 = vld [vmem:[#allocation11 + $0x214] sm:$0xf]  ;;  %v2051_v59 = vld [vmem:[#allocation11 + $0x248] sm:$0xf0] }
  0x4b   :  { %1046 = vmatpush.bf16.msrb.mxu2 %v1721_v46  ;;  %1021 = vmatpush.bf16.msra.mxu0 %v1493_v63  ;;  %v2054_v46 = vld [vmem:[#allocation11 + $0x260] sm:$0xf0]  ;;  %v1758_v54 = vld [vmem:[#allocation11 + $0x21c] sm:$0xf0]  ;;  %v1617_v55 = vor.u32 %v2008_v50, %v1614_v52  ;;  %v2005_v63 = vld [vmem:[#allocation11 + $0xdc] sm:$0xf] }
  0x4c   :  { %v1761_v56 = vor.u32 %v2044_v53, %v1758_v54  ;;  %v1780_v58 = vld [vmem:[#allocation11 + $0x240] sm:$0xf]  ;;  %v1602_v1 = vld [vmem:[#allocation11 + $0xe4] sm:$0xf0]  ;;  %v2071_v57 = vld [vmem:[#allocation11 + $0x2ec] sm:$0xf] }
  0x4d   :  { %1058 = vmatpush.bf16.msra.mxu3 %v1841_v45  ;;  %1033 = vmatpush.bf16.msrb.mxu1 %v1613_v49  ;;  %v1792_v45 = vld [vmem:[#allocation11 + $0x258] sm:$0xf]  ;;  %v1518_v49 = vld [vmem:[#allocation11 + $0x3c] sm:$0xf0]  ;;  %v1746_v3 = vld [vmem:[#allocation11 + $0x204] sm:$0xf0]  ;;  %v1605_v4 = vor.u32 %v2005_v63, %v1602_v1 }
  0x4e   :  { %v1793_v47 = vor.u32 %v2054_v46, %v1792_v45  ;;  %v1521_v51 = vor.u32 %v1984_v48, %v1518_v49  ;;  %v1494_v9 = vld [vmem:[#allocation11 + $0xc] sm:$0xf0]  ;;  %v2002_v10 = vld [vmem:[#allocation11 + $0xc4] sm:$0xf]  ;;  %v1854_v18 = vld [vmem:[#allocation11 + $0x2dc] sm:$0xf0] }
  0x4f   :  { %1047 = vmatpush.bf16.msrb.mxu2 %v1709_v61  ;;  %1070 = vmatpush.bf16.msrb.mxu0 %v1581_v2  ;;  %v1981_v61 = vld [vmem:[#allocation11 + $0x1c] sm:$0xf]  ;;  %v1590_v12 = vld [vmem:[#allocation11 + $0xcc] sm:$0xf0]  ;;  %v1722_v21 = vld [vmem:[#allocation11 + $0x1d4] sm:$0xf0] }
  0x50   :  { %v2041_v2 = vld [vmem:[#allocation11 + $0x1fc] sm:$0xf]  ;;  %v1593_v15 = vor.u32 %v2002_v10, %v1590_v12  ;;  %v2032_v26 = vld [vmem:[#allocation11 + $0x1b4] sm:$0xf]  ;;  %v1710_v27 = vld [vmem:[#allocation11 + $0x1bc] sm:$0xf0] }
  0x51   :  { %1059 = vmatpush.bf16.msra.mxu3 %v1829_v60  ;;  %1034 = vmatpush.bf16.msrb.mxu1 %v1601_v62  ;;  %v1781_v60 = vor.u32 %v2051_v59, %v1780_v58  ;;  %v1506_v62 = vld [vmem:[#allocation11 + $0x24] sm:$0xf0]  ;;  %v1749_v5 = vor.u32 %v2041_v2, %v1746_v3  ;;  %v2065_v22 = vld [vmem:[#allocation11 + $0x2bc] sm:$0xf]  ;;  %v1830_v30 = vld [vmem:[#allocation11 + $0x2ac] sm:$0xf0] }
  0x52   :  { %v1509_v0 = vor.u32 %v1981_v61, %v1506_v62  ;;  %v2029_v34 = vld [vmem:[#allocation11 + $0x19c] sm:$0xf]  ;;  %v1698_v35 = vld [vmem:[#allocation11 + $0x1a4] sm:$0xf0]  ;;  %v2059_v36 = vld [vmem:[#allocation11 + $0x28c] sm:$0xf] }
  0x53   :  { %1071 = vmatpush.bf16.msrb.mxu0 %v1569_v8  ;;  %1048 = vmatpush.bf16.msrb.mxu2 %v1697_v20  ;;  %v1978_v8 = vld [vmem:[#allocation11 + $0x4] sm:$0xf]  ;;  %v2035_v20 = vld [vmem:[#allocation11 + $0x1cc] sm:$0xf]  ;;  %v2056_v45 = vld [vmem:[#allocation11 + $0x274] sm:$0xf] }
  0x54   :  { %v1497_v11 = vor.u32 %v1978_v8, %v1494_v9  ;;  %v1725_v23 = vor.u32 %v2035_v20, %v1722_v21  ;;  %v2026_v43 = vld [vmem:[#allocation11 + $0x184] sm:$0xf]  ;;  %v1806_v48 = vld [vmem:[#allocation11 + $0x27c] sm:$0xf0]  ;;  %v2053_v53 = vld [vmem:[#allocation11 + $0x25c] sm:$0xf] }
  0x55   :  { %1035 = vmatpush.bf16.msrb.mxu1 %v1589_v6  ;;  %1060 = vmatpush.bf16.msra.mxu3 %v1817_v24  ;;  %v1866_v6 = vld [vmem:[#allocation11 + $0x2f4] sm:$0xf0]  ;;  %v1842_v24 = vld [vmem:[#allocation11 + $0x2c4] sm:$0xf0]  ;;  %v2050_v63 = vld [vmem:[#allocation11 + $0x244] sm:$0xf] }
  0x56   :  { %v1845_v25 = vor.u32 %v2065_v22, %v1842_v24  ;;  %v1794_v54 = vld [vmem:[#allocation11 + $0x264] sm:$0xf0]  ;;  %v2001_v8 = vld [vmem:[#allocation11 + $0xb8] sm:$0xf0]  ;;  %v1680_v9 = vld [vmem:[#allocation11 + $0x170] sm:$0xf] }
  0x57   :  { %1072 = vmatpush.bf16.msrb.mxu0 %v1557_v14  ;;  %1049 = vmatpush.bf16.msrb.mxu2 %v1685_v33  ;;  %v1734_v14 = vld [vmem:[#allocation11 + $0x1ec] sm:$0xf0]  ;;  %v2480_v33 = vld [vmem:[%s2517_s5] sm:$0xf]  ;;  %v1668_v24 = vld [vmem:[#allocation11 + $0x158] sm:$0xf] }
  0x58   :  { %v185_v40 = vperm.slane %v2480_v33, 0  ;;  %v186_v41 = vperm.slane %v2480_v33, 1  ;;  %v187_v62 = vperm.slane %v2480_v33, 2  ;;  %v2025_v10 = vld [vmem:[#allocation11 + $0x178] sm:$0xf0]  ;;  %s1435_s13 = sshll.u32 %s2370_s22, 4  ;;  %s1436_s13 = int_to_ptr.vmem [resolvable:$true] %s1435_s13 }
  0x59   :  { %1084 = vmatpush.bf16.msra.mxu1 %v1677_v7  ;;  %1061 = vmatpush.bf16.msra.mxu3 %v1805_v37  ;;  %v1869_v7 = vor.u32 %v2071_v57, %v1866_v6  ;;  %v1701_v37 = vor.u32 %v2029_v34, %v1698_v35  ;;  %v1584_v57 = vld [vmem:[#allocation11 + $0xb0] sm:$0xf]  ;;  %v2019_v34 = vld [vmem:[#allocation11 + $0x148] sm:$0xf0]  ;;  %s1437_s16 = sshll.u32 %s2522_s10, 4  ;;  %s2372_s6 = smov 8   ;;  %s1438_s16 = int_to_ptr.hbm [resolvable:$true] %s1437_s16 }
  0x5b   :  { %1073 = vmatpush.bf16.msrb.mxu0 %v1545_v28  ;;  %1098 = vmatpush.bf16.msra.mxu2 %v1773_v44  ;;  %v2062_v28 = vld [vmem:[#allocation11 + $0x2a4] sm:$0xf]  ;;  %v1686_v44 = vld [vmem:[#allocation11 + $0x18c] sm:$0xf0] }
  0x5c   :  { %v1833_v32 = vor.u32 %v2062_v28, %v1830_v30  ;;  %v1560_v30 = vld [vmem:[#allocation11 + $0x80] sm:$0xf] }
  0x5d   :  { %1085 = vmatpush.bf16.msra.mxu1 %v1665_v13  ;;  %1062 = vmatpush.bf16.msra.mxu3 %v1793_v47  ;;  %v2038_v13 = vld [vmem:[#allocation11 + $0x1e4] sm:$0xf]  ;;  %v1689_v47 = vor.u32 %v2026_v43, %v1686_v44  ;;  %v1992_v43 = vld [vmem:[#allocation11 + $0x70] sm:$0xf0]  ;;  %v1644_v44 = vld [vmem:[#allocation11 + $0x128] sm:$0xf] }
  0x5e   :  { %v1737_v16 = vor.u32 %v2038_v13, %v1734_v14 }
  0x5f   :  { %1074 = vmatpush.bf16.msrb.mxu0 %v1533_v38  ;;  %1099 = vmatpush.bf16.msra.mxu2 %v1761_v56  ;;  %v1818_v38 = vld [vmem:[#allocation11 + $0x294] sm:$0xf0] }
  0x60   :  { %v1821_v39 = vor.u32 %v2059_v36, %v1818_v38 }
  0x61   :  { %1086 = vmatpush.bf16.msra.mxu1 %v1653_v17  ;;  %1063 = vmatpush.bf16.msra.mxu3 %v1781_v60  ;;  %v2068_v17 = vld [vmem:[#allocation11 + $0x2d4] sm:$0xf] }
  0x62   :  { %v1857_v19 = vor.u32 %v2068_v17, %v1854_v18  ;;  %v1681_v17 = vor.u32 %v2025_v10, %v1680_v9  ;;  %v1572_v18 = vld [vmem:[#allocation11 + $0x98] sm:$0xf]  ;;  %v2046_v10 = vld [vmem:[#allocation11 + $0x220] sm:$0xf0] }
  0x63   :  { %1075 = vmatpush.bf16.msrb.mxu0 %v1521_v51  ;;  %1100 = vmatpush.bf16.msra.mxu2 %v1749_v5  ;;  %v1809_v51 = vor.u32 %v2056_v45, %v1806_v48  ;;  %v188_v5 = vperm.slane %v2480_v33, 3  ;;  %v1656_v33 = vld [vmem:[#allocation11 + $0x140] sm:$0xf]  ;;  %v2016_v45 = vld [vmem:[#allocation11 + $0x130] sm:$0xf0] }
  0x64   :  { %v1764_v9 = vld [vmem:[#allocation11 + $0x218] sm:$0xf] }
  0x65   :  { %1087 = vmatpush.bf16.msra.mxu1 %v1641_v29  ;;  %1112 = vmatpush.bf16.msrb.mxu3 %v1869_v7  ;;  %v1713_v29 = vor.u32 %v2032_v26, %v1710_v27 }
  0x67   :  { %1076 = vmatpush.bf16.msrb.mxu0 %v1509_v0  ;;  %1101 = vmatpush.bf16.msra.mxu2 %v1737_v16  ;;  %v1782_v0 = vld [vmem:[#allocation11 + $0x24c] sm:$0xf0]  ;;  %v1585_v16 = vor.u32 %v2001_v8, %v1584_v57  ;;  %v1524_v57 = vld [vmem:[#allocation11 + $0x38] sm:$0xf]  ;;  %v2010_v8 = vld [vmem:[#allocation11 + $0x100] sm:$0xf0] }
  0x68   :  { %v1785_v2 = vor.u32 %v2050_v63, %v1782_v0 }
  0x69   :  { %1088 = vmatpush.bf16.msra.mxu1 %v1629_v42  ;;  %1113 = vmatpush.bf16.msrb.mxu3 %v1857_v19  ;;  %v1998_v19 = vld [vmem:[#allocation11 + $0xa0] sm:$0xf0] }
  0x6a   :  { %v1573_v28 = vor.u32 %v1998_v19, %v1572_v18  ;;  %v1765_v18 = vor.u32 %v2046_v10, %v1764_v9  ;;  %v1608_v19 = vld [vmem:[#allocation11 + $0xe0] sm:$0xf]  ;;  %v2052_v9 = vld [vmem:[#allocation11 + $0x250] sm:$0xf0] }
  0x6b   :  { %1077 = vmatpush.bf16.msrb.mxu0 %v1497_v11  ;;  %1102 = vmatpush.bf16.msra.mxu2 %v1725_v23 }
  0x6d   :  { %1089 = vmatpush.bf16.msra.mxu1 %v1617_v55  ;;  %1114 = vmatpush.bf16.msrb.mxu3 %v1845_v25  ;;  %v1797_v55 = vor.u32 %v2053_v53, %v1794_v54  ;;  %v2022_v25 = vld [vmem:[#allocation11 + $0x160] sm:$0xf0]  ;;  %v1536_v53 = vld [vmem:[#allocation11 + $0x50] sm:$0xf]  ;;  %v1989_v54 = vld [vmem:[#allocation11 + $0x58] sm:$0xf0] }
  0x6f   :  { %1103 = vmatpush.bf16.msra.mxu2 %v1713_v29  ;;  %v1669_v29 = vor.u32 %v2022_v25, %v1668_v24  ;;  %v2007_v24 = vld [vmem:[#allocation11 + $0xe8] sm:$0xf0]  ;;  %v1752_v25 = vld [vmem:[#allocation11 + $0x200] sm:$0xf] }
  0x71   :  { %1090 = vmatpush.bf16.msra.mxu1 %v1605_v4  ;;  %1115 = vmatpush.bf16.msrb.mxu3 %v1833_v32  ;;  %v1995_v32 = vld [vmem:[#allocation11 + $0x88] sm:$0xf0] }
  0x73   :  { %1104 = vmatpush.bf16.msra.mxu2 %v1701_v37  ;;  %v2103_v37 = vld [vmem:[#allocation5] sm:$0xff]  }
  0x75   :  { %1091 = vmatpush.bf16.msra.mxu1 %v1593_v15  ;;  %1116 = vmatpush.bf16.msrb.mxu3 %v1821_v39  ;;  %v1561_v39 = vor.u32 %v1995_v32, %v1560_v30  ;;  %v1980_v32 = vld [vmem:[#allocation11 + $0x10] sm:$0xf0] }
  0x77   :  { %1105 = vmatpush.bf16.msra.mxu2 %v1689_v47  ;;  %v2104_v47 = vunpack.c.l.bf16 %v2103_v37 }
  0x79   :  { %1117 = vmatpush.bf16.msrb.mxu3 %v1809_v51  ;;  %v1645_v51 = vor.u32 %v2016_v45, %v1644_v44 }
  0x7d   :  { %1118 = vmatpush.bf16.msrb.mxu3 %v1797_v55  ;;  %v1632_v55 = vld [vmem:[#allocation11 + $0x110] sm:$0xf] }
  0x81   :  { %1119 = vmatpush.bf16.msrb.mxu3 %v1785_v2 }
  0xb5   :  { %v285_v31 = vpop.f32.mrf.mxu1 }
  0xb6   :  { %v286_v50 = vadd.f32 %v285_v31, %v186_v41 }
  0xb8   :  { %v319_v58 = vmax.f32 %v286_v50, 0.0 }
  0xbb   :  { %v271_v42 = vpop.f32.mrf.mxu3 }
  0xbc   :  { %v272_v49 = vadd.f32 %v271_v42, %v185_v40 }
  0xbd   :  { %v287_v46 = vpop.f32.mrf.mxu1  ;;  %v299_v1 = vpop.f32.mrf.mxu2 }
  0xbe   :  { %v288_v52 = vadd.f32 %v287_v46, %v186_v41  ;;  %v318_v56 = vmax.f32 %v272_v49, 0.0  ;;  %v300_v7 = vadd.f32 %v299_v1, %v187_v62  ;;  %v1548_v41 = vld [vmem:[#allocation11 + $0x68] sm:$0xf]  ;;  %v1537_v1 = vor.u32 %v1989_v54, %v1536_v53  ;;  %v2064_v53 = vld [vmem:[#allocation11 + $0x2b0] sm:$0xf0] }
  0xbf   :  { %v1549_v50 = vor.u32 %v1992_v43, %v1548_v41  ;;  %v2040_v41 = vld [vmem:[#allocation11 + $0x1f0] sm:$0xf0]  ;;  %v1716_v54 = vld [vmem:[#allocation11 + $0x1b8] sm:$0xf] }
  0xc0   :  { %v323_v61 = vmax.f32 %v288_v52, 0.0  ;;  %v326_v3 = vpack.c.bf16 %v319_v58, %v318_v56  ;;  %v320_v20 = vmax.f32 %v300_v7, 0.0  ;;  %v2105_v56 = vunpack.c.h.bf16 %v2103_v37  ;;  %v2013_v58 = vld [vmem:[#allocation11 + $0x118] sm:$0xf0]  ;;  %v1620_v7 = vld [vmem:[#allocation11 + $0xf8] sm:$0xf] }
  0xc1   :  { %v1860_v37 = vld [vmem:[#allocation11 + $0x2d8] sm:$0xf] }
  0xc2   :  { %v348_v11 = vunpack.c.l.b16 %v326_v3  ;;  %v349_v12 = vunpack.c.h.b16 %v326_v3 }
  0xc3   :  { %v273_v59 = vpop.f32.mrf.mxu3 }
  0xc4   :  { %v274_v60 = vadd.f32 %v273_v59, %v185_v40  ;;  %v1657_v40 = vor.u32 %v2019_v34, %v1656_v33  ;;  %v1776_v59 = vld [vmem:[#allocation11 + $0x230] sm:$0xf]  ;;  %v1609_v34 = vor.u32 %v2007_v24, %v1608_v19  ;;  %v2086_v24 = vld [vmem:[#allocation14 + $0x60] sm:$0xff] }
  0xc5   :  { %v301_v27 = vpop.f32.mrf.mxu2  ;;  %v2087_v19 = vld [vmem:[#allocation14 + $0x68] sm:$0xff] }
  0xc6   :  { %v322_v4 = vmax.f32 %v274_v60, 0.0  ;;  %v302_v35 = vadd.f32 %v301_v27, %v187_v62  ;;  %v2049_v60 = vld [vmem:[#allocation11 + $0x238] sm:$0xf0] }
  0xc8   :  { %v328_v6 = vpack.c.bf16 %v323_v61, %v322_v4  ;;  %v324_v46 = vmax.f32 %v302_v35, 0.0  ;;  %v1633_v4 = vor.u32 %v2013_v58, %v1632_v55  ;;  %v2034_v55 = vld [vmem:[#allocation11 + $0x1c0] sm:$0xf0] }
  0xc9   :  { %v1717_v58 = vor.u32 %v2034_v55, %v1716_v54 }
  0xca   :  { %v351_v13 = vunpack.c.l.b16 %v328_v6  ;;  %v352_v14 = vunpack.c.h.b16 %v328_v6  ;;  %v1986_v6 = vld [vmem:[#allocation11 + $0x40] sm:$0xf0] }
  0xcb   :  { %v313_v15 = vpop.f32.mrf.mxu3 }
  0xcc   :  { %v314_v21 = vadd.f32 %v313_v15, %v188_v5  ;;  %v2486_v22 = vpack.c.b16 %v351_v13, %v348_v11  ;;  %v2488_v23 = vpack.c.b16 %v352_v14, %v349_v12  ;;  %v1525_v13 = vor.u32 %v1986_v6, %v1524_v57  ;;  %v1512_v14 = vld [vmem:[#allocation11 + $0x20] sm:$0xf]  ;;  %v1983_v15 = vld [vmem:[#allocation11 + $0x28] sm:$0xf0] }
  0xcd   :  { %v1800_v57 = vld [vmem:[#allocation11 + $0x260] sm:$0xf]  ;;  %v2055_v6 = vld [vmem:[#allocation11 + $0x268] sm:$0xf0] }
  0xce   :  { %v321_v26 = vmax.f32 %v314_v21, 0.0  ;;  %1022 = vmatmul.bf16.vlgmr.msra.gmra.mxu0 %v2486_v22  ;;  %1036 = vmatmul.bf16.vlgmr.msrb.gmra.mxu1 %v2488_v23  ;;  %v2073_v21 = vld [vmem:[#allocation11 + $0x2f8] sm:$0xf0] }
  0xcf   :  { %1126 = vmatpush.bf16.msra.mxu0 %v1585_v16  ;;  %1140 = vmatpush.bf16.msrb.mxu1 %v1681_v17  ;;  %v1621_v17 = vor.u32 %v2010_v8, %v1620_v7  ;;  %v1801_v7 = vor.u32 %v2055_v6, %v1800_v57  ;;  %v1788_v8 = vld [vmem:[#allocation11 + $0x248] sm:$0xf] }
  0xd0   :  { %v327_v31 = vpack.c.bf16 %v321_v26, %v320_v20  ;;  %v1872_v20 = vld [vmem:[#allocation11 + $0x2f0] sm:$0xf]  ;;  %v2043_v26 = vld [vmem:[#allocation11 + $0x208] sm:$0xf0]  ;;  %v1789_v10 = vor.u32 %v2052_v9, %v1788_v8 }
  0xd1   :  { %v1873_v30 = vor.u32 %v2073_v21, %v1872_v20  ;;  %v1753_v35 = vor.u32 %v2043_v26, %v1752_v25  ;;  %v2074_v21 = vld [vmem:[#allocation14] sm:$0xff]  ;;  %v2085_v25 = vld [vmem:[#allocation14 + $0x58] sm:$0xff] }
  0xd2   :  { %v334_v36 = vrot.slane %v327_v31, 4  ;;  %v350_v62 = vunpack.c.l.b16 %v327_v31  ;;  %v1500_v31 = vld [vmem:[#allocation11 + $0x8] sm:$0xf]  ;;  %v2097_v26 = vld [vmem:[#allocation14 + $0xb8] sm:$0xff] }
  0xd3   :  { %v315_v38 = vpop.f32.mrf.mxu3  ;;  %1127 = vmatpush.bf16.msra.mxu0 %v1573_v28  ;;  %1141 = vmatpush.bf16.msrb.mxu1 %v1669_v29  ;;  %v1513_v29 = vor.u32 %v1983_v15, %v1512_v14  ;;  %v2078_v14 = vld [vmem:[#allocation14 + $0x20] sm:$0xff]  ;;  %v2077_v15 = vld [vmem:[#allocation14 + $0x18] sm:$0xff] }
  0xd4   :  { %v316_v42 = vadd.f32 %v315_v38, %v188_v5  ;;  %v338_v48 = vunpack.c.l.bf16 %v334_v36  ;;  %v1777_v5 = vor.u32 %v2049_v60, %v1776_v59  ;;  %v1596_v36 = vld [vmem:[#allocation11 + $0xc8] sm:$0xf]  ;;  %v2070_v38 = vld [vmem:[#allocation11 + $0x2e0] sm:$0xf0]  ;;  %v1824_v59 = vld [vmem:[#allocation11 + $0x290] sm:$0xf] }
  0xd5   :  { %v1861_v43 = vor.u32 %v2070_v38, %v1860_v37  ;;  %v2061_v60 = vld [vmem:[#allocation11 + $0x298] sm:$0xf0]  ;;  %v2082_v37 = vld [vmem:[#allocation14 + $0x40] sm:$0xff] }
  0xd6   :  { %v325_v49 = vmax.f32 %v316_v42, 0.0  ;;  %v342_v61 = vadd.f32 %v2104_v47, %v338_v48  ;;  %v1501_v42 = vor.u32 %v1980_v32, %v1500_v31  ;;  %v2067_v47 = vld [vmem:[#allocation11 + $0x2c8] sm:$0xf0]  ;;  %v1728_v48 = vld [vmem:[#allocation11 + $0x1d0] sm:$0xf]  ;;  %v2094_v38 = vld [vmem:[#allocation14 + $0xa0] sm:$0xff] }
  0xd7   :  { %1128 = vmatpush.bf16.msra.mxu0 %v1561_v39  ;;  %1142 = vmatpush.bf16.msrb.mxu1 %v1657_v40  ;;  %v2004_v39 = vld [vmem:[#allocation11 + $0xd0] sm:$0xf0]  ;;  %v1740_v40 = vld [vmem:[#allocation11 + $0x1e8] sm:$0xf]  ;;  %v2083_v31 = vld [vmem:[#allocation14 + $0x48] sm:$0xff] }
  0xd8   :  { %v329_v52 = vpack.c.bf16 %v325_v49, %v324_v46  ;;  %v344_v11 = vpack.c.bf16 %v342_v61, %v342_v61  ;;  %v1597_v44 = vor.u32 %v2004_v39, %v1596_v36  ;;  %v1741_v45 = vor.u32 %v2040_v41, %v1740_v40  ;;  %v1848_v46 = vld [vmem:[#allocation11 + $0x2c0] sm:$0xf]  ;;  %v2037_v49 = vld [vmem:[#allocation11 + $0x1d8] sm:$0xf0]  ;;  %v2095_v32 = vld [vmem:[#allocation14 + $0xa8] sm:$0xff] }
  0xd9   :  { %v1704_v61 = vld [vmem:[#allocation11 + $0x1a0] sm:$0xf] }
  0xda   :  { %v335_v63 = vrot.slane %v329_v52, 4  ;;  %v353_v0 = vunpack.c.l.b16 %v329_v52  ;;  %v362_v27 = vunpack.c.l.b16 %v344_v11  ;;  %v1836_v52 = vld [vmem:[#allocation11 + $0x2a8] sm:$0xf]  ;;  %v2081_v11 = vld [vmem:[#allocation14 + $0x38] sm:$0xff] }
  0xdb   :  { %1129 = vmatpush.bf16.msra.mxu0 %v1549_v50  ;;  %1143 = vmatpush.bf16.msrb.mxu1 %v1645_v51  ;;  %v1849_v50 = vor.u32 %v2067_v47, %v1848_v46  ;;  %v1729_v51 = vor.u32 %v2037_v49, %v1728_v48  ;;  %v2093_v41 = vld [vmem:[#allocation14 + $0x98] sm:$0xff]  ;;  %v2092_v46 = vld [vmem:[#allocation14 + $0x90] sm:$0xff] }
  0xdc   :  { %v339_v2 = vunpack.c.l.bf16 %v335_v63  ;;  %v2492_v3 = vpack.c.b16 %v353_v0, %v350_v62  ;;  %v2031_v62 = vld [vmem:[#allocation11 + $0x1a8] sm:$0xf0]  ;;  %v1825_v63 = vor.u32 %v2061_v60, %v1824_v59 }
  0xdd   :  { %v1705_v0 = vor.u32 %v2031_v62, %v1704_v61  ;;  %v2090_v61 = vld [vmem:[#allocation14 + $0x80] sm:$0xff] }
  0xde   :  { %v343_v12 = vadd.f32 %v2105_v56, %v339_v2  ;;  %1050 = vmatmul.bf16.vlgmr.msrb.gmra.mxu2 %v2492_v3  ;;  %1078 = vmatmul.bf16.vlgmr.msrb.gmra.mxu0 %v2486_v22  ;;  %v1837_v56 = vor.u32 %v2064_v53, %v1836_v52  ;;  %v2058_v2 = vld [vmem:[#allocation11 + $0x280] sm:$0xf0]  ;;  %v2091_v52 = vld [vmem:[#allocation14 + $0x88] sm:$0xff] }
  0xdf   :  { %1092 = vmatmul.bf16.vlgmr.msra.gmra.mxu1 %v2488_v23  ;;  %1130 = vmatpush.bf16.msra.mxu0 %v1537_v1  ;;  %v1812_v1 = vld [vmem:[#allocation11 + $0x278] sm:$0xf] }
  0xe0   :  { %v345_v16 = vpack.c.bf16 %v343_v12, %v343_v12  ;;  %1144 = vmatpush.bf16.msrb.mxu1 %v1633_v4  ;;  %1154 = vmatpush.bf16.msrb.mxu2 %v1777_v5  ;;  %v1692_v4 = vld [vmem:[#allocation11 + $0x188] sm:$0xf]  ;;  %v2028_v5 = vld [vmem:[#allocation11 + $0x190] sm:$0xf0] }
  0xe1   :  { %v2080_v12 = vld [vmem:[#allocation14 + $0x30] sm:$0xff] }
  0xe2   :  { %v363_v28 = vunpack.c.l.b16 %v345_v16  ;;  %v2089_v16 = vld [vmem:[#allocation14 + $0x78] sm:$0xff] }
  0xe3   :  { %1131 = vmatpush.bf16.msra.mxu0 %v1525_v13  ;;  %v2079_v13 = vld [vmem:[#allocation14 + $0x28] sm:$0xff] }
  0xe4   :  { %1145 = vmatpush.bf16.msrb.mxu1 %v1621_v17  ;;  %1155 = vmatpush.bf16.msrb.mxu2 %v1765_v18  ;;  %v2497_v33 = vpack.c.b16 %v363_v28, %v362_v27  ;;  %v2076_v17 = vld [vmem:[#allocation14 + $0x10] sm:$0xff] }
  0xe5   :  { %v2088_v18 = vld [vmem:[#allocation14 + $0x70] sm:$0xff] }
  0xe6   :  { %1064 = vmatmul.bf16.vlgmr.msra.gmra.mxu3 %v2497_v33  ;;  %v2084_v28 = vld [vmem:[#allocation14 + $0x50] sm:$0xff] }
  0xe7   :  { %1132 = vmatpush.bf16.msra.mxu0 %v1513_v29  ;;  %1168 = vmatpush.bf16.msra.mxu3 %v1873_v30  ;;  %v2096_v29 = vld [vmem:[#allocation14 + $0xb0] sm:$0xff] }
  0xe8   :  { %1146 = vmatpush.bf16.msrb.mxu1 %v1609_v34  ;;  %1156 = vmatpush.bf16.msrb.mxu2 %v1753_v35 }
  0xeb   :  { %1133 = vmatpush.bf16.msra.mxu0 %v1501_v42  ;;  %1169 = vmatpush.bf16.msra.mxu3 %v1861_v43 }
  0xec   :  { %1147 = vmatpush.bf16.msrb.mxu1 %v1597_v44  ;;  %1157 = vmatpush.bf16.msrb.mxu2 %v1741_v45 }
  0xee   :  { %1106 = vmatmul.bf16.vlgmr.msra.gmra.mxu2 %v2492_v3  ;;  %1134 = vmatmul.bf16.vlgmr.msra.gmra.mxu0 %v2486_v22  ;;  %v1813_v22 = vor.u32 %v2058_v2, %v1812_v1 }
  0xef   :  { %1148 = vmatmul.bf16.vlgmr.msrb.gmra.mxu1 %v2488_v23  ;;  %1170 = vmatpush.bf16.msra.mxu3 %v1849_v50  ;;  %v1693_v23 = vor.u32 %v2028_v5, %v1692_v4 }
  0xf0   :  { %1158 = vmatpush.bf16.msrb.mxu2 %v1729_v51  ;;  %1387 = vmatpush.bf16.msrb.mxu0 %v2081_v11 }
  0xf1   :  { %1401 = vmatpush.bf16.msra.mxu1 %v2089_v16 }
  0xf3   :  { %1171 = vmatpush.bf16.msra.mxu3 %v1837_v56 }
  0xf4   :  { %1159 = vmatpush.bf16.msrb.mxu2 %v1717_v58  ;;  %1388 = vmatpush.bf16.msrb.mxu0 %v2080_v12 }
  0xf5   :  { %1402 = vmatpush.bf16.msra.mxu1 %v2088_v18 }
  0xf6   :  { %1120 = vmatmul.bf16.vlgmr.msrb.gmra.mxu3 %v2497_v33 }
  0xf7   :  { %1172 = vmatpush.bf16.msra.mxu3 %v1825_v63 }
  0xf8   :  { %1160 = vmatpush.bf16.msrb.mxu2 %v1705_v0  ;;  %1389 = vmatpush.bf16.msrb.mxu0 %v2079_v13 }
  0xf9   :  { %1403 = vmatpush.bf16.msra.mxu1 %v2087_v19 }
  0xfb   :  { %1173 = vmatpush.bf16.msra.mxu3 %v1813_v22 }
  0xfc   :  { %1161 = vmatpush.bf16.msrb.mxu2 %v1693_v23  ;;  %1390 = vmatpush.bf16.msrb.mxu0 %v2078_v14 }
  0xfd   :  { %1404 = vmatpush.bf16.msra.mxu1 %v2086_v24 }
  0xff   :  { %1162 = vmatmul.bf16.vlgmr.msrb.gmra.mxu2 %v2492_v3  ;;  %1174 = vmatpush.bf16.msra.mxu3 %v1801_v7  ;;  %v2075_v3 = vld [vmem:[#allocation14 + $0x8] sm:$0xff] }
 0x100   :  { %1391 = vmatpush.bf16.msrb.mxu0 %v2077_v15  ;;  %1415 = vmatpush.bf16.msra.mxu2 %v2097_v26 }
 0x101   :  { %1405 = vmatpush.bf16.msra.mxu1 %v2085_v25 }
 0x103   :  { %1175 = vmatpush.bf16.msra.mxu3 %v1789_v10 }
 0x104   :  { %1392 = vmatpush.bf16.msrb.mxu0 %v2076_v17  ;;  %1416 = vmatpush.bf16.msra.mxu2 %v2096_v29 }
 0x105   :  { %1406 = vmatpush.bf16.msra.mxu1 %v2084_v28 }
 0x106   :  { %1176 = vmatmul.bf16.vlgmr.msra.gmra.mxu3 %v2497_v33  ;;  %v494_v33 = vld [vmem:[#allocation13] sm:$0x7] }
 0x107   :  { %v496_v35 = vperm.slane %v494_v33, 0  ;;  %v497_v58 = vperm.slane %v494_v33, 1  ;;  %v498_v12 = vperm.slane %v494_v33, 2 }
 0x108   :  { %1393 = vmatpush.bf16.msrb.mxu0 %v2075_v3  ;;  %1417 = vmatpush.bf16.msra.mxu2 %v2095_v32 }
 0x109   :  { %1407 = vmatpush.bf16.msra.mxu1 %v2083_v31 }
 0x10c   :  { %1394 = vmatpush.bf16.msrb.mxu0 %v2074_v21  ;;  %1418 = vmatpush.bf16.msra.mxu2 %v2094_v38 }
 0x10d   :  { %1408 = vmatpush.bf16.msra.mxu1 %v2082_v37 }
 0x110   :  { %1419 = vmatpush.bf16.msra.mxu2 %v2093_v41 }
 0x114   :  { %1420 = vmatpush.bf16.msra.mxu2 %v2092_v46 }
 0x118   :  { %1421 = vmatpush.bf16.msra.mxu2 %v2091_v52 }
 0x11c   :  { %1422 = vmatpush.bf16.msra.mxu2 %v2090_v61 }
 0x14b   :  { %v1023_v20 = vpop.f32.mrf.mxu0  ;;  %v1037_v27 = vpop.f32.mrf.mxu1 }
 0x14c   :  { %v1024_v39 = vadd.f32 %v1023_v20, %v496_v35 }
 0x14e   :  { %v1038_v45 = vadd.f32 %v1037_v27, %v1024_v39 }
 0x153   :  { %v1025_v30 = vpop.f32.mrf.mxu0  ;;  %v1039_v36 = vpop.f32.mrf.mxu1 }
 0x154   :  { %v1026_v44 = vadd.f32 %v1025_v30, %v496_v35 }
 0x156   :  { %v1040_v47 = vadd.f32 %v1039_v36, %v1026_v44 }
 0x15b   :  { %v1079_v40 = vpop.f32.mrf.mxu0 }
 0x15c   :  { %v1093_v48 = vpop.f32.mrf.mxu1  ;;  %v1080_v63 = vadd.f32 %v1079_v40, %v497_v58 }
 0x15e   :  { %v1094_v5 = vadd.f32 %v1093_v48, %v1080_v63 }
 0x161   :  { %v1051_v34 = vpop.f32.mrf.mxu2 }
 0x162   :  { %v1052_v49 = vadd.f32 %v1051_v34, %v1038_v45  ;;  %v2126_v34 = vld [vmem:[%s2521_s9] ss:$0 sm:$0xff]  ;;  %s2371_s9 = smov 128  }
 0x163   :  { %v1081_v56 = vpop.f32.mrf.mxu0 }
 0x164   :  { %v1095_v0 = vpop.f32.mrf.mxu1  ;;  %v1082_v4 = vadd.f32 %v1081_v56, %v497_v58 }
 0x166   :  { %v1096_v23 = vadd.f32 %v1095_v0, %v1082_v4 }
 0x169   :  { %v1053_v42 = vpop.f32.mrf.mxu2  ;;  %v1065_v43 = vpop.f32.mrf.mxu3 }
 0x16a   :  { %v1054_v50 = vadd.f32 %v1053_v42, %v1040_v47  ;;  %v1066_v51 = vadd.f32 %v1065_v43, %v1052_v49 }
 0x16b   :  { %v1135_v22 = vpop.f32.mrf.mxu0 }
 0x16c   :  { %v1182_v59 = vmax.f32 %v1066_v51, 0.0  ;;  %v1149_v10 = vpop.f32.mrf.mxu1  ;;  %v1136_v17 = vadd.f32 %v1135_v22, %v498_v12 }
 0x16e   :  { %v1150_v19 = vadd.f32 %v1149_v10, %v1136_v17 }
 0x171   :  { %v1067_v53 = vpop.f32.mrf.mxu3  ;;  %v1107_v54 = vpop.f32.mrf.mxu2 }
 0x172   :  { %v1068_v55 = vadd.f32 %v1067_v53, %v1054_v50  ;;  %v1108_v57 = vadd.f32 %v1107_v54, %v1094_v5 }
 0x173   :  { %v1137_v16 = vpop.f32.mrf.mxu0 }
 0x174   :  { %v1185_v60 = vmax.f32 %v1068_v55, 0.0  ;;  %v1138_v3 = vadd.f32 %v1137_v16, %v498_v12  ;;  %v1151_v20 = vpop.f32.mrf.mxu1 }
 0x176   :  { %v1188_v62 = vpack.c.bf16 %v1185_v60, %v1182_v59  ;;  %v1152_v24 = vadd.f32 %v1151_v20, %v1138_v3 }
 0x178   :  { %1395 = vmatmul.bf16.vlgmr.msrb.gmra.mxu0 %v1188_v62 }
 0x179   :  { %v1109_v1 = vpop.f32.mrf.mxu2  ;;  %v1121_v2 = vpop.f32.mrf.mxu3 }
 0x17a   :  { %v1110_v6 = vadd.f32 %v1109_v1, %v1096_v23  ;;  %v1122_v7 = vadd.f32 %v1121_v2, %v1108_v57 }
 0x17c   :  { %v1183_v13 = vmax.f32 %v1122_v7, 0.0 }
 0x181   :  { %v1123_v8 = vpop.f32.mrf.mxu3 }
 0x182   :  { %v1124_v9 = vadd.f32 %v1123_v8, %v1110_v6  ;;  %v1163_v11 = vpop.f32.mrf.mxu2 }
 0x183   :  { %v1164_v25 = vadd.f32 %v1163_v11, %v1150_v19 }
 0x184   :  { %v1186_v14 = vmax.f32 %v1124_v9, 0.0 }
 0x186   :  { %v1189_v15 = vpack.c.bf16 %v1186_v14, %v1183_v13 }
 0x188   :  { %1409 = vmatmul.bf16.vlgmr.msra.gmra.mxu1 %v1189_v15 }
 0x189   :  { %v1177_v18 = vpop.f32.mrf.mxu3 }
 0x18a   :  { %v1165_v21 = vpop.f32.mrf.mxu2  ;;  %v1178_v27 = vadd.f32 %v1177_v18, %v1164_v25 }
 0x18b   :  { %v1166_v26 = vadd.f32 %v1165_v21, %v1152_v24 }
 0x18c   :  { %v1184_v30 = vmax.f32 %v1178_v27, 0.0 }
 0x191   :  { %v1179_v28 = vpop.f32.mrf.mxu3 }
 0x192   :  { %v1180_v29 = vadd.f32 %v1179_v28, %v1166_v26 }
 0x194   :  { %v1187_v31 = vmax.f32 %v1180_v29, 0.0 }
 0x196   :  { %v1190_v32 = vpack.c.bf16 %v1187_v31, %v1184_v30 }
 0x198   :  { %1423 = vmatmul.bf16.vlgmr.msra.gmra.mxu2 %v1190_v32 }
 0x1f5   :  { %v1396_v33 = vpop.f32.mrf.mxu0 }
 0x1f6   :  { %v1397_v36 = vadd.f32 %v2126_v34, %v1396_v33 }
 0x1fd   :  { %v1398_v40 = vpop.f32.mrf.mxu0 }
 0x1fe   :  { %v1399_v42 = vadd.f32 %v2126_v34, %v1398_v40 }
 0x205   :  { %v1410_v35 = vpop.f32.mrf.mxu1 }
 0x206   :  { %v1411_v37 = vadd.f32 %v1410_v35, %v1397_v36 }
 0x20d   :  { %v1412_v41 = vpop.f32.mrf.mxu1 }
 0x20e   :  { %v1413_v43 = vadd.f32 %v1412_v41, %v1399_v42 }
 0x21b   :  { %v1424_v38 = vpop.f32.mrf.mxu2 }
 0x21c   :  { %v1425_v39 = vadd.f32 %v1424_v38, %v1411_v37 }
 0x21e   :  { %1429 = vst [vmem:[#allocation16] sm:$0xff] %v1425_v39 }
 0x223   :  { %v1426_v44 = vpop.f32.mrf.mxu2 }
 0x224   :  { %v1427_v45 = vadd.f32 %v1426_v44, %v1413_v43 }
 0x226   :  { %1430 = vst [vmem:[#allocation16 + $0x8] sm:$0xff] %v1427_v45 }
 0x227   :  { %1443 = dma.vmem_to_hbm [thread:$0]  %s1436_s13, 256, %s1438_s16, [#allocation4], %s2371_s9, %s2371_s9, %s2372_s6  }
 0x228   :  { %2353 = dma.done.wait [#allocation4], 256  }
 0x229   :  { %2354 = vsyncadd [#allocation4], 4294967040 }
 0x22a   :  { %1448 = vsyncpa [#allocation3], 1 }
 0x22b   :  { %1449 = vsyncpa [#allocation6], 1 }
 0x22c   :  { %1450 = vsyncpa [#allocation9], 1 }
 0x22d   :  { %1451 = vsyncpa [#allocation12], 1 }
 0x22e   :  { %1452 = vsyncpa [#allocation15], 1 }
 0x22f   :  { %1453 = vsyncpa [#allocation4], 1 }

</bundles_post_ra>
